<compile_context>
chip_gen: v5e
topology: v5e:2x2
jax: 0.10.0
libtpu: 0.0.40
codegen_flags: <defaults>
</compile_context>

<pallas_src>
import jax
import jax.numpy as jnp
from jax.experimental import pallas as pl
from jax.experimental.pallas import tpu as pltpu


def _round_up(v, m):
    return ((v + m - 1) // m) * m


def _era_classifier_kernel(x_ref, w_ref, b_ref, o_ref):
    # x_ref: (block_b, D)     VMEM  activation tile (batch rows on sublanes)
    # w_ref: (1, D)           VMEM  classifier weight row, resident across grid
    # b_ref: (1, 1)           SMEM  scalar bias
    # o_ref: (1, 1, block_b)  VMEM  lane-dense sigmoid(logits) for this tile
    #
    # NOTE: the kernel is pure HBM streaming (0.5 FLOP/byte), so the M=1
    # contraction below costs nothing on the critical path; using dot_general
    # (instead of a VPU multiply + cross-lane reduce) makes the result come out
    # lane-major for free, so the (1, block_b) store needs no relayout.
    logits = jax.lax.dot_general(
        w_ref[...], x_ref[...],
        dimension_numbers=(((1,), (1,)), ((), ())),   # contract over D
        preferred_element_type=jnp.float32,
    )                                                  # (1, block_b), f32
    logits = logits + b_ref[0, 0]                      # scalar bias from SMEM
    o_ref[0] = jax.nn.sigmoid(logits).astype(o_ref.dtype)


def era_activation_classifier(x, weight, bias, *, block_b=None,
                              target_tile_bytes=2 * 1024 * 1024):
    """sigmoid(x @ weight.T + bias)  ==  torch.sigmoid(nn.Linear(D, 1)(x)).

    x:      (B, D) float32 or bfloat16
    weight: (1, D) (PyTorch nn.Linear weight layout; (D,) also accepted)
    bias:   (1,)
    returns (B, 1) in x.dtype
    """
    B, D = x.shape
    out_dtype = x.dtype
    w_row = jnp.asarray(weight).reshape(1, D).astype(x.dtype)
    b11 = jnp.asarray(bias, jnp.float32).reshape(1, 1)

    itemsize = jnp.dtype(x.dtype).itemsize
    b8 = _round_up(B, 8)
    if block_b is None:
        # ~2 MiB x tiles: near HBM roofline for this bandwidth-bound kernel
        # while double-buffering comfortably inside every generation's
        # scoped-VMEM limit (incl. v7x).
        cap = max(8, ((target_tile_bytes // (D * itemsize)) // 8) * 8)
        block_b = min(cap, b8)
    else:
        # Guard the (8, 128) BlockSpec constraint for caller-supplied sizes.
        block_b = min(_round_up(max(int(block_b), 1), 8), b8)

    nb = pl.cdiv(b8, block_b)
    b_pad = nb * block_b
    if b_pad != B:
        # Ragged batch: pad with zero rows (one extra copy, only when ragged);
        # padded rows are sliced off below.
        x = jnp.pad(x, ((0, b_pad - B), (0, 0)))

    out = pl.pallas_call(
        _era_classifier_kernel,
        out_shape=jax.ShapeDtypeStruct((nb, 1, block_b), out_dtype),
        grid_spec=pltpu.PrefetchScalarGridSpec(
            num_scalar_prefetch=0,
            grid=(nb,),
            in_specs=[
                pl.BlockSpec((block_b, D), lambda i: (i, 0)),        # x tile
                pl.BlockSpec((1, D), lambda i: (0, 0)),              # weight (resident)
                pl.BlockSpec(memory_space=pltpu.MemorySpace.SMEM),   # bias scalar
            ],
            out_specs=pl.BlockSpec((1, 1, block_b), lambda i: (i, 0, 0)),
        ),
        compiler_params=pltpu.CompilerParams(
            # Batch tiles are independent: shard across v7x's two TensorCores.
            dimension_semantics=("parallel",)),
    )(x, w_row, b11)

    # (nb, 1, block_b) flattens row-major into batch order -> (b_pad, 1).
    return out.reshape(b_pad, 1)[:B]


if __name__ == "__main__":
    key = jax.random.PRNGKey(0)
    k_x, k_w, k_b = jax.random.split(key, 3)

    batch, input_dim = 8, 32
    x = jax.random.normal(k_x, (batch, input_dim), dtype=jnp.float32)
    # Deterministic synthetic parameters (nn.Linear(input_dim, 1) shapes).
    weight = jax.random.normal(k_w, (1, input_dim), dtype=jnp.float32) * 0.1
    bias = jax.random.normal(k_b, (1,), dtype=jnp.float32) * 0.1

    out = jax.block_until_ready(era_activation_classifier(x, weight, bias))
    ref = jax.nn.sigmoid(x @ weight.T + bias)
    assert out.shape == (batch, 1)
    assert jnp.allclose(out, ref, atol=1e-5, rtol=1e-5)

    # Exercise the tiled / ragged-batch path (multi-step parallel grid + pad).
    x2 = jax.random.normal(jax.random.fold_in(k_x, 1), (300, input_dim),
                           dtype=jnp.float32)
    out2 = jax.block_until_ready(
        era_activation_classifier(x2, weight, bias, block_b=64))
    ref2 = jax.nn.sigmoid(x2 @ weight.T + bias)
    assert out2.shape == (300, 1)
    assert jnp.allclose(out2, ref2, atol=1e-5, rtol=1e-5)

    print("KERNEL_OK")
</pallas_src>

<mosaic_0001>
module attributes {stable_mosaic.version = 11 : i64} {
  func.func @_era_classifier_kernel(%arg0: i32, %arg1: memref<8x32xf32, #tpu.memory_space<vmem>>, %arg2: memref<1x32xf32, #tpu.memory_space<vmem>>, %arg3: memref<1x1xf32, #tpu.memory_space<smem>>, %arg4: memref<1x1x8xf32, #tpu.memory_space<vmem>>) attributes {dimension_semantics = [#tpu.dimension_semantics<parallel>], iteration_bounds = array<i64: 1>, scalar_prefetch = 0 : i64, scratch_operands = 0 : i64, tpu.core_type = #tpu.core_type<tc>, window_params = [{transform_indices = @transform_0, window_bounds = array<i64: 8, 32>}, {pipeline_mode = #tpu.pipeline_mode<synchronous>, transform_indices = @transform_1, window_bounds = array<i64: 1, 32>}, {transform_indices = @transform_2, window_bounds = array<i64: 1, 1>}, {transform_indices = @transform_3, window_bounds = array<i64: 1, 1, 8>}]} {
    %c0 = arith.constant 0 : index
    %c0_0 = arith.constant 0 : index
    %0 = vector.load %arg2[%c0, %c0_0] : memref<1x32xf32, #tpu.memory_space<vmem>>, vector<1x32xf32>
    %c0_1 = arith.constant 0 : index
    %c0_2 = arith.constant 0 : index
    %1 = vector.load %arg1[%c0_1, %c0_2] : memref<8x32xf32, #tpu.memory_space<vmem>>, vector<8x32xf32>
    %cst = arith.constant dense<0.000000e+00> : vector<1x8xf32>
    %2 = tpu.matmul %0, %1, %cst {dimension_numbers = #tpu.dot_dimension_numbers<[1], [1], [0], [0], [0, 0, 1, 0], [], []>} : vector<1x32xf32>, vector<8x32xf32>, vector<1x8xf32> -> vector<1x8xf32>
    %c0_3 = arith.constant 0 : index
    %c0_4 = arith.constant 0 : index
    %3 = memref.load %arg3[%c0_3, %c0_4] : memref<1x1xf32, #tpu.memory_space<smem>>
    %4 = vector.broadcast %3 : f32 to vector<1x8xf32>
    %5 = arith.addf %2, %4 : vector<1x8xf32>
    %6 = arith.negf %5 : vector<1x8xf32>
    %7 = math.exp %6 : vector<1x8xf32>
    %cst_5 = arith.constant 1.000000e+00 : f32
    %8 = vector.broadcast %cst_5 : f32 to vector<1x8xf32>
    %9 = arith.addf %8, %7 : vector<1x8xf32>
    %10 = arith.divf %8, %9 : vector<1x8xf32>
    %c0_6 = arith.constant 0 : index
    %c0_7 = arith.constant 0 : index
    %c0_8 = arith.constant 0 : index
    %11 = vector.load %arg4[%c0_6, %c0_7, %c0_8] : memref<1x1x8xf32, #tpu.memory_space<vmem>>, vector<1x1x8xf32>
    %12 = vector.shape_cast %11 : vector<1x1x8xf32> to vector<1x8xf32>
    %13 = vector.shape_cast %10 : vector<1x8xf32> to vector<1x1x8xf32>
    tpu.vector_store %arg4[%c0_6, %c0_7, %c0_8], %13 {strides = array<i32>} : memref<1x1x8xf32, #tpu.memory_space<vmem>>, vector<1x1x8xf32>,
    return
  }
  func.func @transform_0(%arg0: i32) -> (i32, i32) {
    %c0_i32 = arith.constant 0 : i32
    %c0_i32_0 = arith.constant 0 : i32
    return %arg0, %c0_i32 : i32, i32
  }
  func.func @transform_1(%arg0: i32) -> (i32, i32) {
    %c0_i32 = arith.constant 0 : i32
    %c0_i32_0 = arith.constant 0 : i32
    %c0_i32_1 = arith.constant 0 : i32
    return %c0_i32, %c0_i32_0 : i32, i32
  }
  func.func @transform_2(%arg0: i32) -> (i32, i32) {
    %c0_i32 = arith.constant 0 : i32
    %c0_i32_0 = arith.constant 0 : i32
    %c0_i32_1 = arith.constant 0 : i32
    return %c0_i32, %c0_i32_0 : i32, i32
  }
  func.func @transform_3(%arg0: i32) -> (i32, i32, i32) {
    %c0_i32 = arith.constant 0 : i32
    %c0_i32_0 = arith.constant 0 : i32
    %c0_i32_1 = arith.constant 0 : i32
    return %arg0, %c0_i32, %c0_i32_0 : i32, i32, i32
  }
}

</mosaic_0001>

<bundles_post_ra>
// kernel: tpu_custom_call.1
= control target key start
LH: loop header
LB: loop body
LE: loop exit
PB: predicated region body
PF: predicated region fallthrough
CT: control target
= control target key end

     0   :  { %9 = vsyncpa [#allocation4], 0  ;;  %s194_s0 = inlined_call_operand.hbm [shape: f32[8,32], index: 0, kind: input, shape index: {}]   ;;  %s195_s1 = inlined_call_operand.vmem [shape: f32[1,32], index: 1, kind: input, shape index: {}]   ;;  %s196_s2 = inlined_call_operand.<no memory space> [shape: f32[1,1], index: 2, kind: input, shape index: {}]   ;;  %s197_s3 = inlined_call_operand.hbm [shape: f32[1,1,8], index: 3, kind: output, shape index: {}]  }
   0x1   :  { %10 = vsyncpa [#allocation5], 0  ;;  %s16_s14 = sshll.u32 %s194_s0, 4  ;;  %s160_s15 = smov [#allocation3]   ;;  %s17_s14 = int_to_ptr.hbm [resolvable:$true] %s16_s14 }
   0x2   :  { %s18_s16 = sshll.u32 %s160_s15, 4  ;;  %s19_s16 = int_to_ptr.vmem [resolvable:$true] %s18_s16 }
   0x3   :  { %21 = dma.hbm_to_vmem [thread:$0]  %s17_s14, 128, %s19_s16, [#allocation4]  }
   0x4   :  { %156 = dma.done.wait [#allocation4], 128  }
   0x5   :  { %157 = vsyncadd [#allocation4], 4294967168  ;;  %vm34_vm0 = vcmask 261120   ;;  %v31_v0 = vld [vmem:[#allocation3] sm:$0xff]  ;;  %v33_v2 = vstv %s196_s2  ;;  %s161_s0 = smov [#allocation6]   ;;  %s89_s2 = sshll.u32 %s197_s3, 4  ;;  %s90_s2 = int_to_ptr.hbm [resolvable:$true] %s89_s2 }
   0x6   :  { %99 = vmatpush.xpose.msk.msra.mxu0 %vm34_vm0, %v31_v0  ;;  %v30_v1 = vld [vmem:[%s195_s1] sm:$0x1]  ;;  %s87_s1 = sshll.u32 %s161_s0, 4  ;;  %vm80_vm4 = vcmask 57344   ;;  %s88_s1 = int_to_ptr.vmem [resolvable:$true] %s87_s1 }
   0x9   :  { %100 = vmatmul.msk.f32.vlgmr.msra.gmra.mxu0 %vm34_vm0, %v30_v1 }
  0x86   :  { %v58_v3 = vpop.f32.mrf.mxu0 }
  0x87   :  { %v59_v4 = vadd.f32 %v58_v3, %v33_v2 }
  0x89   :  { %v101_v5 = vmul.f32 -1.442695, %v59_v4 }
  0x8b   :  { %104 = vpow2.f32 %v101_v5 }
  0x91   :  { %v105_v6 = vpop.eup %104 }
  0x92   :  { %v64_v7 = vadd.f32 1.0, %v105_v6 }
  0x94   :  { %106 = vrcp.f32 %v64_v7  ;;  %v76_v11 = vand.u32 2147483648, %v64_v7  ;;  %v74_v13 = vand.u32 2147483647, %v64_v7  ;;  %vm70_vm2 = vweird.f32 %v64_v7 }
  0x96   :  { %v77_v15 = vor.u32 1.1754944e-38, %v76_v11  ;;  %vm75_vm5 = vcmp.eq.f32.partialorder %v74_v13, 8.507059e+37 }
  0x9a   :  { %v107_v8 = vpop.eup %106 }
  0x9b   :  { %v66_v9 = vmul.f32 %v107_v8, %v64_v7  ;;  %vm71_vm1 = vweird.f32 %v107_v8 }
  0x9c   :  { %vm72_vm3 = vmor %vm70_vm2, %vm71_vm1 }
  0x9d   :  { %v67_v10 = vsub.f32 1.0, %v66_v9 }
  0x9f   :  { %v68_v12 = vmul.f32 %v107_v8, %v67_v10 }
  0xa1   :  { %v69_v14 = vadd.f32 %v107_v8, %v68_v12 }
  0xa3   :  { %v73_v16 = vsel %vm72_vm3, %v107_v8, %v69_v14 }
  0xa4   :  { %v78_v17 = vsel %vm75_vm5, %v77_v15, %v73_v16 }
  0xa5   :  { %81 = vst.msk [vmem:[#allocation6] sm:$0x1] %vm80_vm4, %v78_v17 }
  0xa6   :  { %92 = dma.vmem_to_hbm [thread:$0]  %s88_s1, 16, %s90_s2, [#allocation5]  }
  0xa7   :  { %158 = dma.done.wait [#allocation5], 16  }
  0xa8   :  { %159 = vsyncadd [#allocation5], 4294967280 }
  0xa9   :  { %97 = vsyncpa [#allocation4], 1 }
  0xaa   :  { %98 = vsyncpa [#allocation5], 1 }

</bundles_post_ra>
